<compile_context>
chip_gen: v5e
topology: v5e:2x2
jax: 0.10.0
libtpu: 0.0.40
codegen_flags: <defaults>
</compile_context>

<pallas_src>
import functools

import jax
import jax.numpy as jnp
from jax import lax
from jax.experimental import pallas as pl
from jax.experimental.pallas import tpu as pltpu


def _round_up(x, m):
    return (x + m - 1) // m * m


def _compl_mul_kernel(u_ref, w_ref, o_ref, *, ck, unroll):
    """One grid step: accumulate one Cin chunk into one (2, B, tco, tm) output tile.

    u_ref : (2, ck, B,   tm)  stacked real/imag planes of the u_ft mode slab
    w_ref : (2, ck, tco, tm)  stacked real/imag planes of the weights
    o_ref : (2, B,  tco, tm)  stacked real/imag output tile (f32); its block index does
                              not change along the innermost (Cin-chunk) grid axis, so it
                              stays VMEM-resident and serves as the reduction accumulator.

    out[b, o, m] = sum_i u[i, b, m] * w[i, o, m]   (complex, per-mode channel mix)
    """
    k = pl.program_id(2)
    _, B, tco, tm = o_ref.shape

    # TODO(synk): for wide channels (Cin, Cout >= ~64) replace this VPU broadcast-FMA
    # reduction with per-mode-block MXU contractions (batched lax.dot_general, bf16
    # operands / f32 accumulation) — the largest remaining lever at production FNO
    # widths; the VPU path below is the verified baseline.
    def body(i, carry):
        acc_r, acc_i = carry
        ar = u_ref[0, i][:, None, :]      # (B, 1, tm)   sublane-broadcast over Cout
        ai = u_ref[1, i][:, None, :]
        br = w_ref[0, i][None, :, :]      # (1, tco, tm) leading-dim broadcast over B
        bi = w_ref[1, i][None, :, :]
        acc_r = acc_r + (ar * br - ai * bi)
        acc_i = acc_i + (ar * bi + ai * br)
        return acc_r, acc_i

    zeros = jnp.zeros((B, tco, tm), jnp.float32)
    acc_r, acc_i = lax.fori_loop(0, ck, body, (zeros, zeros), unroll=unroll)

    @pl.when(k == 0)
    def _():
        o_ref[0] = acc_r
        o_ref[1] = acc_i

    @pl.when(k > 0)
    def _():
        o_ref[0] += acc_r
        o_ref[1] += acc_i


def _compl_mul_modes_pallas(u_modes, w_modes):
    """u_modes: (Cin, B, Mt) complex; w_modes: (Cin, Cout, Mt) complex
    -> (B, Cout, Mt) complex64 with out[b,o,m] = sum_i u[i,b,m] * w[i,o,m]."""
    Cin, B, Mt = u_modes.shape
    Cout = w_modes.shape[1]

    # ---- tile selection -----------------------------------------------------------
    # Mode (lane) tile in {128, 256, 512}: as large as the mode count needs while the
    # register accumulator 2*B*tco*tm (at the minimum tco=8) stays ~<= 16K f32
    # (~16 of the 64 vregs), so it never spills to VMEM.
    tm = 128
    while tm < 512 and tm < _round_up(Mt, 128) and 2 * B * 8 * (tm * 2) <= 16384:
        tm *= 2
    Mp = _round_up(Mt, tm)

    tco_cap = max(8, min(32, (16384 // (2 * B * tm)) // 8 * 8))
    tco = min(tco_cap, _round_up(Cout, 8))
    Coutp = _round_up(Cout, tco)

    # Cin chunk per grid step: bound the double-buffered u+w block footprint to
    # ~<= 24 MiB so the pipeline also fits v7x's 64 MiB/TC VMEM with headroom.
    ck = min(Cin, 64)
    while ck > 8 and 2 * (2 * ck * (B + tco) * tm * 4) > 24 * (1 << 20):
        ck = max(8, ck // 2)
    Cin_p = _round_up(Cin, ck)

    # ---- pad + stack real/imag (one DMA stream per operand) ------------------------
    # NOTE: kept f32 for exact parity; bf16 operands (f32 accumulation) would halve DMA
    # on v6e/v7x if reduced precision is acceptable.
    u_st = jnp.stack([u_modes.real, u_modes.imag], axis=0).astype(jnp.float32)
    u_st = jnp.pad(u_st, ((0, 0), (0, Cin_p - Cin), (0, 0), (0, Mp - Mt)))
    w_st = jnp.stack([w_modes.real, w_modes.imag], axis=0).astype(jnp.float32)
    w_st = jnp.pad(w_st, ((0, 0), (0, Cin_p - Cin), (0, Coutp - Cout), (0, Mp - Mt)))

    # Double-buffered block footprint -> explicit scoped-VMEM limit (default is only
    # 32 MiB on v6e/v7x, 16 MiB on v5e).
    u_blk = 2 * ck * B * tm * 4
    w_blk = 2 * ck * tco * tm * 4
    o_blk = 2 * B * tco * tm * 4
    footprint = 2 * (u_blk + w_blk + o_blk)
    vmem_limit = int(min(96 << 20, max(32 << 20, 2 * footprint)))

    kernel = functools.partial(_compl_mul_kernel, ck=ck, unroll=min(ck, 8))
    # Grid order: mode tiles (outer), Cout tiles (inner), Cin chunks (innermost,
    # reduction).  u's block index is independent of `co`, so consecutive Cout tiles
    # reuse the resident u block instead of re-DMA'ing it.
    grid = (Mp // tm, Coutp // tco, Cin_p // ck)

    out_st = pl.pallas_call(
        kernel,
        out_shape=jax.ShapeDtypeStruct((2, B, Coutp, Mp), jnp.float32),
        grid_spec=pltpu.PrefetchScalarGridSpec(
            num_scalar_prefetch=0,
            grid=grid,
            in_specs=[
                pl.BlockSpec((2, ck, B, tm), lambda m, co, k: (0, k, 0, m)),
                pl.BlockSpec((2, ck, tco, tm), lambda m, co, k: (0, k, co, m)),
            ],
            out_specs=pl.BlockSpec((2, B, tco, tm), lambda m, co, k: (0, 0, co, m)),
        ),
        compiler_params=pltpu.CompilerParams(
            # m/co independent -> shard across v7x's two TensorCores (free on v5e/v6e);
            # Cin-chunk is the reduction axis.
            # TODO(synk): verify megacore sharding on v7x via xprof; fall back to an
            # explicit leading core axis if one TC stays idle.
            dimension_semantics=("parallel", "parallel", "arbitrary"),
            vmem_limit_bytes=vmem_limit),
    )(u_st, w_st)

    out = out_st[0, :, :Cout, :Mt] + 1j * out_st[1, :, :Cout, :Mt]
    return out.astype(jnp.complex64)


def spectral_conv2d_forward(u, w1, w2, modes1, modes2):
    """Forward pass of SpectralConv2d with x_in=None, x_out=None.

    u  : (B, Cin, H, W) float32      (NCHW, like PyTorch)
    w1 : (Cin, Cout, modes1, modes2) complex64
    w2 : (Cin, Cout, modes1, modes2) complex64
    returns (B, Cout, H, W) float32
    """
    B, Cin, H, W = u.shape
    Cout = w1.shape[1]
    M = modes1 * modes2

    # TODO(synk): no Pallas FFT primitive; rfft2 / irfft2 stay as XLA ops.
    u_ft = jnp.fft.rfft2(u)                                   # (B, Cin, H, W//2+1) c64

    top = u_ft[:, :, :modes1, :modes2].reshape(B, Cin, M)     # low positive modes
    bot = u_ft[:, :, -modes1:, :modes2].reshape(B, Cin, M)    # negative modes
    u_modes = jnp.transpose(jnp.concatenate([top, bot], axis=-1), (1, 0, 2))  # (Cin,B,2M)

    # Fold both weight factors onto one mode axis -> a single kernel launch.
    w_modes = jnp.concatenate(
        [w1.reshape(Cin, Cout, M), w2.reshape(Cin, Cout, M)], axis=-1)  # (Cin,Cout,2M)

    out_modes = _compl_mul_modes_pallas(u_modes, w_modes)     # (B, Cout, 2M) c64

    f1 = out_modes[:, :, :M].reshape(B, Cout, modes1, modes2)
    f2 = out_modes[:, :, M:].reshape(B, Cout, modes1, modes2)

    # TODO(synk): the full-size zero-init + two scatters around irfft2 are an extra HBM
    # pass; kept for exact scatter-semantics parity with the PyTorch module (XLA fuses
    # the zero-fill + set in practice).
    out_ft = jnp.zeros((B, Cout, H, W // 2 + 1), jnp.complex64)
    out_ft = out_ft.at[:, :, :modes1, :modes2].set(f1)
    out_ft = out_ft.at[:, :, -modes1:, :modes2].set(f2)

    return jnp.fft.irfft2(out_ft, s=(H, W)).astype(jnp.float32)


def _reference_forward(u, w1, w2, modes1, modes2):
    """Pure-JAX reference mirroring the PyTorch forward (x_in=x_out=None)."""
    B, Cin, H, W = u.shape
    Cout = w1.shape[1]
    u_ft = jnp.fft.rfft2(u)
    f1 = jnp.einsum('bixy,ioxy->boxy', u_ft[:, :, :modes1, :modes2], w1,
                    precision=lax.Precision.HIGHEST)
    f2 = jnp.einsum('bixy,ioxy->boxy', u_ft[:, :, -modes1:, :modes2], w2,
                    precision=lax.Precision.HIGHEST)
    out_ft = jnp.zeros((B, Cout, H, W // 2 + 1), jnp.complex64)
    out_ft = out_ft.at[:, :, :modes1, :modes2].set(f1)
    out_ft = out_ft.at[:, :, -modes1:, :modes2].set(f2)
    return jnp.fft.irfft2(out_ft, s=(H, W)).real.astype(jnp.float32)


if __name__ == "__main__":
    # Small deterministic config: batch=2, in_channels=4, out_channels=4,
    # spatial 16x16, modes1=modes2=4.
    B, Cin, Cout, H, W = 2, 4, 4, 16, 16
    modes1, modes2 = 4, 4

    key = jax.random.PRNGKey(0)
    k_u, k_w1r, k_w1i, k_w2r, k_w2i = jax.random.split(key, 5)

    u = jax.random.normal(k_u, (B, Cin, H, W), dtype=jnp.float32)

    # Mirrors: scale * torch.rand(Cin, Cout, m1, m2, dtype=cfloat)
    # (uniform [0,1) for both real and imag parts, scaled by 1/(Cin*Cout)).
    scale = 1.0 / (Cin * Cout)
    wshape = (Cin, Cout, modes1, modes2)
    w1 = (scale * jax.random.uniform(k_w1r, wshape)
          + 1j * scale * jax.random.uniform(k_w1i, wshape)).astype(jnp.complex64)
    w2 = (scale * jax.random.uniform(k_w2r, wshape)
          + 1j * scale * jax.random.uniform(k_w2i, wshape)).astype(jnp.complex64)

    fwd = jax.jit(functools.partial(spectral_conv2d_forward,
                                    modes1=modes1, modes2=modes2))
    out = jax.block_until_ready(fwd(u, w1, w2))

    ref = jax.block_until_ready(_reference_forward(u, w1, w2, modes1, modes2))
    assert out.shape == (B, Cout, H, W), out.shape
    max_err = float(jnp.max(jnp.abs(out - ref)))
    assert max_err < 1e-4, max_err

    print("KERNEL_OK")
</pallas_src>

<mosaic_0001>
module attributes {stable_mosaic.version = 11 : i64} {
  func.func @_compl_mul_kernel(%arg0: i32, %arg1: i32, %arg2: i32, %arg3: memref<2x4x2x128xf32, #tpu.memory_space<vmem>>, %arg4: memref<2x4x8x128xf32, #tpu.memory_space<vmem>>, %arg5: memref<2x2x8x128xf32, #tpu.memory_space<vmem>>) attributes {dimension_semantics = [#tpu.dimension_semantics<parallel>, #tpu.dimension_semantics<parallel>, #tpu.dimension_semantics<arbitrary>], iteration_bounds = array<i64: 1, 1, 1>, scalar_prefetch = 0 : i64, scratch_operands = 0 : i64, tpu.core_type = #tpu.core_type<tc>, window_params = [{transform_indices = @transform_0, window_bounds = array<i64: 2, 4, 2, 128>}, {transform_indices = @transform_1, window_bounds = array<i64: 2, 4, 8, 128>}, {transform_indices = @transform_2, window_bounds = array<i64: 2, 2, 8, 128>}]} {
    %cst = arith.constant 0.000000e+00 : f32
    %0 = vector.broadcast %cst : f32 to vector<2x8x128xf32>
    %c0_i32 = arith.constant 0 : i32
    %c0 = arith.constant 0 : index
    %1 = arith.index_cast %c0_i32 : i32 to index
    %c0_0 = arith.constant 0 : index
    %c0_1 = arith.constant 0 : index
    %2 = vector.load %arg3[%c0, %1, %c0_0, %c0_1] : memref<2x4x2x128xf32, #tpu.memory_space<vmem>>, vector<1x1x2x128xf32>
    %3 = vector.shape_cast %2 : vector<1x1x2x128xf32> to vector<2x128xf32>
    %4 = vector.shape_cast %3 : vector<2x128xf32> to vector<2x1x128xf32>
    %c1 = arith.constant 1 : index
    %5 = arith.index_cast %c0_i32 : i32 to index
    %c0_2 = arith.constant 0 : index
    %c0_3 = arith.constant 0 : index
    %6 = vector.load %arg3[%c1, %5, %c0_2, %c0_3] : memref<2x4x2x128xf32, #tpu.memory_space<vmem>>, vector<1x1x2x128xf32>
    %7 = vector.shape_cast %6 : vector<1x1x2x128xf32> to vector<2x128xf32>
    %8 = vector.shape_cast %7 : vector<2x128xf32> to vector<2x1x128xf32>
    %c0_4 = arith.constant 0 : index
    %9 = arith.index_cast %c0_i32 : i32 to index
    %c0_5 = arith.constant 0 : index
    %c0_6 = arith.constant 0 : index
    %10 = vector.load %arg4[%c0_4, %9, %c0_5, %c0_6] : memref<2x4x8x128xf32, #tpu.memory_space<vmem>>, vector<1x1x8x128xf32>
    %11 = vector.shape_cast %10 : vector<1x1x8x128xf32> to vector<8x128xf32>
    %12 = vector.shape_cast %11 : vector<8x128xf32> to vector<1x8x128xf32>
    %c1_7 = arith.constant 1 : index
    %13 = arith.index_cast %c0_i32 : i32 to index
    %c0_8 = arith.constant 0 : index
    %c0_9 = arith.constant 0 : index
    %14 = vector.load %arg4[%c1_7, %13, %c0_8, %c0_9] : memref<2x4x8x128xf32, #tpu.memory_space<vmem>>, vector<1x1x8x128xf32>
    %15 = vector.shape_cast %14 : vector<1x1x8x128xf32> to vector<8x128xf32>
    %16 = vector.shape_cast %15 : vector<8x128xf32> to vector<1x8x128xf32>
    %17 = vector.broadcast %4 : vector<2x1x128xf32> to vector<2x8x128xf32>
    %18 = vector.broadcast %12 : vector<1x8x128xf32> to vector<2x8x128xf32>
    %19 = arith.mulf %17, %18 : vector<2x8x128xf32>
    %20 = vector.broadcast %8 : vector<2x1x128xf32> to vector<2x8x128xf32>
    %21 = vector.broadcast %16 : vector<1x8x128xf32> to vector<2x8x128xf32>
    %22 = arith.mulf %20, %21 : vector<2x8x128xf32>
    %23 = arith.subf %19, %22 : vector<2x8x128xf32>
    %24 = arith.addf %0, %23 : vector<2x8x128xf32>
    %25 = vector.broadcast %4 : vector<2x1x128xf32> to vector<2x8x128xf32>
    %26 = vector.broadcast %16 : vector<1x8x128xf32> to vector<2x8x128xf32>
    %27 = arith.mulf %25, %26 : vector<2x8x128xf32>
    %28 = vector.broadcast %8 : vector<2x1x128xf32> to vector<2x8x128xf32>
    %29 = vector.broadcast %12 : vector<1x8x128xf32> to vector<2x8x128xf32>
    %30 = arith.mulf %28, %29 : vector<2x8x128xf32>
    %31 = arith.addf %27, %30 : vector<2x8x128xf32>
    %32 = arith.addf %0, %31 : vector<2x8x128xf32>
    %c1_i32 = arith.constant 1 : i32
    %c0_10 = arith.constant 0 : index
    %33 = arith.index_cast %c1_i32 : i32 to index
    %c0_11 = arith.constant 0 : index
    %c0_12 = arith.constant 0 : index
    %34 = vector.load %arg3[%c0_10, %33, %c0_11, %c0_12] : memref<2x4x2x128xf32, #tpu.memory_space<vmem>>, vector<1x1x2x128xf32>
    %35 = vector.shape_cast %34 : vector<1x1x2x128xf32> to vector<2x128xf32>
    %36 = vector.shape_cast %35 : vector<2x128xf32> to vector<2x1x128xf32>
    %c1_13 = arith.constant 1 : index
    %37 = arith.index_cast %c1_i32 : i32 to index
    %c0_14 = arith.constant 0 : index
    %c0_15 = arith.constant 0 : index
    %38 = vector.load %arg3[%c1_13, %37, %c0_14, %c0_15] : memref<2x4x2x128xf32, #tpu.memory_space<vmem>>, vector<1x1x2x128xf32>
    %39 = vector.shape_cast %38 : vector<1x1x2x128xf32> to vector<2x128xf32>
    %40 = vector.shape_cast %39 : vector<2x128xf32> to vector<2x1x128xf32>
    %c0_16 = arith.constant 0 : index
    %41 = arith.index_cast %c1_i32 : i32 to index
    %c0_17 = arith.constant 0 : index
    %c0_18 = arith.constant 0 : index
    %42 = vector.load %arg4[%c0_16, %41, %c0_17, %c0_18] : memref<2x4x8x128xf32, #tpu.memory_space<vmem>>, vector<1x1x8x128xf32>
    %43 = vector.shape_cast %42 : vector<1x1x8x128xf32> to vector<8x128xf32>
    %44 = vector.shape_cast %43 : vector<8x128xf32> to vector<1x8x128xf32>
    %c1_19 = arith.constant 1 : index
    %45 = arith.index_cast %c1_i32 : i32 to index
    %c0_20 = arith.constant 0 : index
    %c0_21 = arith.constant 0 : index
    %46 = vector.load %arg4[%c1_19, %45, %c0_20, %c0_21] : memref<2x4x8x128xf32, #tpu.memory_space<vmem>>, vector<1x1x8x128xf32>
    %47 = vector.shape_cast %46 : vector<1x1x8x128xf32> to vector<8x128xf32>
    %48 = vector.shape_cast %47 : vector<8x128xf32> to vector<1x8x128xf32>
    %49 = vector.broadcast %36 : vector<2x1x128xf32> to vector<2x8x128xf32>
    %50 = vector.broadcast %44 : vector<1x8x128xf32> to vector<2x8x128xf32>
    %51 = arith.mulf %49, %50 : vector<2x8x128xf32>
    %52 = vector.broadcast %40 : vector<2x1x128xf32> to vector<2x8x128xf32>
    %53 = vector.broadcast %48 : vector<1x8x128xf32> to vector<2x8x128xf32>
    %54 = arith.mulf %52, %53 : vector<2x8x128xf32>
    %55 = arith.subf %51, %54 : vector<2x8x128xf32>
    %56 = arith.addf %24, %55 : vector<2x8x128xf32>
    %57 = vector.broadcast %36 : vector<2x1x128xf32> to vector<2x8x128xf32>
    %58 = vector.broadcast %48 : vector<1x8x128xf32> to vector<2x8x128xf32>
    %59 = arith.mulf %57, %58 : vector<2x8x128xf32>
    %60 = vector.broadcast %40 : vector<2x1x128xf32> to vector<2x8x128xf32>
    %61 = vector.broadcast %44 : vector<1x8x128xf32> to vector<2x8x128xf32>
    %62 = arith.mulf %60, %61 : vector<2x8x128xf32>
    %63 = arith.addf %59, %62 : vector<2x8x128xf32>
    %64 = arith.addf %32, %63 : vector<2x8x128xf32>
    %c2_i32 = arith.constant 2 : i32
    %c0_22 = arith.constant 0 : index
    %65 = arith.index_cast %c2_i32 : i32 to index
    %c0_23 = arith.constant 0 : index
    %c0_24 = arith.constant 0 : index
    %66 = vector.load %arg3[%c0_22, %65, %c0_23, %c0_24] : memref<2x4x2x128xf32, #tpu.memory_space<vmem>>, vector<1x1x2x128xf32>
    %67 = vector.shape_cast %66 : vector<1x1x2x128xf32> to vector<2x128xf32>
    %68 = vector.shape_cast %67 : vector<2x128xf32> to vector<2x1x128xf32>
    %c1_25 = arith.constant 1 : index
    %69 = arith.index_cast %c2_i32 : i32 to index
    %c0_26 = arith.constant 0 : index
    %c0_27 = arith.constant 0 : index
    %70 = vector.load %arg3[%c1_25, %69, %c0_26, %c0_27] : memref<2x4x2x128xf32, #tpu.memory_space<vmem>>, vector<1x1x2x128xf32>
    %71 = vector.shape_cast %70 : vector<1x1x2x128xf32> to vector<2x128xf32>
    %72 = vector.shape_cast %71 : vector<2x128xf32> to vector<2x1x128xf32>
    %c0_28 = arith.constant 0 : index
    %73 = arith.index_cast %c2_i32 : i32 to index
    %c0_29 = arith.constant 0 : index
    %c0_30 = arith.constant 0 : index
    %74 = vector.load %arg4[%c0_28, %73, %c0_29, %c0_30] : memref<2x4x8x128xf32, #tpu.memory_space<vmem>>, vector<1x1x8x128xf32>
    %75 = vector.shape_cast %74 : vector<1x1x8x128xf32> to vector<8x128xf32>
    %76 = vector.shape_cast %75 : vector<8x128xf32> to vector<1x8x128xf32>
    %c1_31 = arith.constant 1 : index
    %77 = arith.index_cast %c2_i32 : i32 to index
    %c0_32 = arith.constant 0 : index
    %c0_33 = arith.constant 0 : index
    %78 = vector.load %arg4[%c1_31, %77, %c0_32, %c0_33] : memref<2x4x8x128xf32, #tpu.memory_space<vmem>>, vector<1x1x8x128xf32>
    %79 = vector.shape_cast %78 : vector<1x1x8x128xf32> to vector<8x128xf32>
    %80 = vector.shape_cast %79 : vector<8x128xf32> to vector<1x8x128xf32>
    %81 = vector.broadcast %68 : vector<2x1x128xf32> to vector<2x8x128xf32>
    %82 = vector.broadcast %76 : vector<1x8x128xf32> to vector<2x8x128xf32>
    %83 = arith.mulf %81, %82 : vector<2x8x128xf32>
    %84 = vector.broadcast %72 : vector<2x1x128xf32> to vector<2x8x128xf32>
    %85 = vector.broadcast %80 : vector<1x8x128xf32> to vector<2x8x128xf32>
    %86 = arith.mulf %84, %85 : vector<2x8x128xf32>
    %87 = arith.subf %83, %86 : vector<2x8x128xf32>
    %88 = arith.addf %56, %87 : vector<2x8x128xf32>
    %89 = vector.broadcast %68 : vector<2x1x128xf32> to vector<2x8x128xf32>
    %90 = vector.broadcast %80 : vector<1x8x128xf32> to vector<2x8x128xf32>
    %91 = arith.mulf %89, %90 : vector<2x8x128xf32>
    %92 = vector.broadcast %72 : vector<2x1x128xf32> to vector<2x8x128xf32>
    %93 = vector.broadcast %76 : vector<1x8x128xf32> to vector<2x8x128xf32>
    %94 = arith.mulf %92, %93 : vector<2x8x128xf32>
    %95 = arith.addf %91, %94 : vector<2x8x128xf32>
    %96 = arith.addf %64, %95 : vector<2x8x128xf32>
    %c3_i32 = arith.constant 3 : i32
    %c0_34 = arith.constant 0 : index
    %97 = arith.index_cast %c3_i32 : i32 to index
    %c0_35 = arith.constant 0 : index
    %c0_36 = arith.constant 0 : index
    %98 = vector.load %arg3[%c0_34, %97, %c0_35, %c0_36] : memref<2x4x2x128xf32, #tpu.memory_space<vmem>>, vector<1x1x2x128xf32>
    %99 = vector.shape_cast %98 : vector<1x1x2x128xf32> to vector<2x128xf32>
    %100 = vector.shape_cast %99 : vector<2x128xf32> to vector<2x1x128xf32>
    %c1_37 = arith.constant 1 : index
    %101 = arith.index_cast %c3_i32 : i32 to index
    %c0_38 = arith.constant 0 : index
    %c0_39 = arith.constant 0 : index
    %102 = vector.load %arg3[%c1_37, %101, %c0_38, %c0_39] : memref<2x4x2x128xf32, #tpu.memory_space<vmem>>, vector<1x1x2x128xf32>
    %103 = vector.shape_cast %102 : vector<1x1x2x128xf32> to vector<2x128xf32>
    %104 = vector.shape_cast %103 : vector<2x128xf32> to vector<2x1x128xf32>
    %c0_40 = arith.constant 0 : index
    %105 = arith.index_cast %c3_i32 : i32 to index
    %c0_41 = arith.constant 0 : index
    %c0_42 = arith.constant 0 : index
    %106 = vector.load %arg4[%c0_40, %105, %c0_41, %c0_42] : memref<2x4x8x128xf32, #tpu.memory_space<vmem>>, vector<1x1x8x128xf32>
    %107 = vector.shape_cast %106 : vector<1x1x8x128xf32> to vector<8x128xf32>
    %108 = vector.shape_cast %107 : vector<8x128xf32> to vector<1x8x128xf32>
    %c1_43 = arith.constant 1 : index
    %109 = arith.index_cast %c3_i32 : i32 to index
    %c0_44 = arith.constant 0 : index
    %c0_45 = arith.constant 0 : index
    %110 = vector.load %arg4[%c1_43, %109, %c0_44, %c0_45] : memref<2x4x8x128xf32, #tpu.memory_space<vmem>>, vector<1x1x8x128xf32>
    %111 = vector.shape_cast %110 : vector<1x1x8x128xf32> to vector<8x128xf32>
    %112 = vector.shape_cast %111 : vector<8x128xf32> to vector<1x8x128xf32>
    %113 = vector.broadcast %100 : vector<2x1x128xf32> to vector<2x8x128xf32>
    %114 = vector.broadcast %108 : vector<1x8x128xf32> to vector<2x8x128xf32>
    %115 = arith.mulf %113, %114 : vector<2x8x128xf32>
    %116 = vector.broadcast %104 : vector<2x1x128xf32> to vector<2x8x128xf32>
    %117 = vector.broadcast %112 : vector<1x8x128xf32> to vector<2x8x128xf32>
    %118 = arith.mulf %116, %117 : vector<2x8x128xf32>
    %119 = arith.subf %115, %118 : vector<2x8x128xf32>
    %120 = arith.addf %88, %119 : vector<2x8x128xf32>
    %121 = vector.broadcast %100 : vector<2x1x128xf32> to vector<2x8x128xf32>
    %122 = vector.broadcast %112 : vector<1x8x128xf32> to vector<2x8x128xf32>
    %123 = arith.mulf %121, %122 : vector<2x8x128xf32>
    %124 = vector.broadcast %104 : vector<2x1x128xf32> to vector<2x8x128xf32>
    %125 = vector.broadcast %108 : vector<1x8x128xf32> to vector<2x8x128xf32>
    %126 = arith.mulf %124, %125 : vector<2x8x128xf32>
    %127 = arith.addf %123, %126 : vector<2x8x128xf32>
    %128 = arith.addf %96, %127 : vector<2x8x128xf32>
    %c4_i32 = arith.constant 4 : i32
    %c0_i32_46 = arith.constant 0 : i32
    %129 = arith.cmpi eq, %arg2, %c0_i32_46 : i32
    %130 = arith.extui %129 : i1 to i32
    %c0_i32_47 = arith.constant 0 : i32
    %131 = arith.cmpi ne, %130, %c0_i32_47 : i32
    scf.if %131 {
      %c0_50 = arith.constant 0 : index
      %c0_51 = arith.constant 0 : index
      %c0_52 = arith.constant 0 : index
      %c0_53 = arith.constant 0 : index
      %135 = vector.load %arg5[%c0_50, %c0_51, %c0_52, %c0_53] : memref<2x2x8x128xf32, #tpu.memory_space<vmem>>, vector<1x2x8x128xf32>
      %136 = vector.shape_cast %135 : vector<1x2x8x128xf32> to vector<2x8x128xf32>
      %137 = vector.shape_cast %120 : vector<2x8x128xf32> to vector<1x2x8x128xf32>
      tpu.vector_store %arg5[%c0_50, %c0_51, %c0_52, %c0_53], %137 {strides = array<i32>} : memref<2x2x8x128xf32, #tpu.memory_space<vmem>>, vector<1x2x8x128xf32>,
      %c1_54 = arith.constant 1 : index
      %c0_55 = arith.constant 0 : index
      %c0_56 = arith.constant 0 : index
      %c0_57 = arith.constant 0 : index
      %138 = vector.load %arg5[%c1_54, %c0_55, %c0_56, %c0_57] : memref<2x2x8x128xf32, #tpu.memory_space<vmem>>, vector<1x2x8x128xf32>
      %139 = vector.shape_cast %138 : vector<1x2x8x128xf32> to vector<2x8x128xf32>
      %140 = vector.shape_cast %128 : vector<2x8x128xf32> to vector<1x2x8x128xf32>
      tpu.vector_store %arg5[%c1_54, %c0_55, %c0_56, %c0_57], %140 {strides = array<i32>} : memref<2x2x8x128xf32, #tpu.memory_space<vmem>>, vector<1x2x8x128xf32>,
    } else {
    }
    %c0_i32_48 = arith.constant 0 : i32
    %132 = arith.cmpi sgt, %arg2, %c0_i32_48 : i32
    %133 = arith.extui %132 : i1 to i32
    %c0_i32_49 = arith.constant 0 : i32
    %134 = arith.cmpi ne, %133, %c0_i32_49 : i32
    scf.if %134 {
      %c0_50 = arith.constant 0 : index
      %c0_51 = arith.constant 0 : index
      %c0_52 = arith.constant 0 : index
      %c0_53 = arith.constant 0 : index
      %135 = vector.load %arg5[%c0_50, %c0_51, %c0_52, %c0_53] : memref<2x2x8x128xf32, #tpu.memory_space<vmem>>, vector<1x2x8x128xf32>
      %136 = vector.shape_cast %135 : vector<1x2x8x128xf32> to vector<2x8x128xf32>
      %137 = arith.addf %136, %120 : vector<2x8x128xf32>
      %c0_54 = arith.constant 0 : index
      %c0_55 = arith.constant 0 : index
      %c0_56 = arith.constant 0 : index
      %c0_57 = arith.constant 0 : index
      %138 = vector.load %arg5[%c0_54, %c0_55, %c0_56, %c0_57] : memref<2x2x8x128xf32, #tpu.memory_space<vmem>>, vector<1x2x8x128xf32>
      %139 = vector.shape_cast %138 : vector<1x2x8x128xf32> to vector<2x8x128xf32>
      %140 = vector.shape_cast %137 : vector<2x8x128xf32> to vector<1x2x8x128xf32>
      tpu.vector_store %arg5[%c0_54, %c0_55, %c0_56, %c0_57], %140 {strides = array<i32>} : memref<2x2x8x128xf32, #tpu.memory_space<vmem>>, vector<1x2x8x128xf32>,
      %c1_58 = arith.constant 1 : index
      %c0_59 = arith.constant 0 : index
      %c0_60 = arith.constant 0 : index
      %c0_61 = arith.constant 0 : index
      %141 = vector.load %arg5[%c1_58, %c0_59, %c0_60, %c0_61] : memref<2x2x8x128xf32, #tpu.memory_space<vmem>>, vector<1x2x8x128xf32>
      %142 = vector.shape_cast %141 : vector<1x2x8x128xf32> to vector<2x8x128xf32>
      %143 = arith.addf %142, %128 : vector<2x8x128xf32>
      %c1_62 = arith.constant 1 : index
      %c0_63 = arith.constant 0 : index
      %c0_64 = arith.constant 0 : index
      %c0_65 = arith.constant 0 : index
      %144 = vector.load %arg5[%c1_62, %c0_63, %c0_64, %c0_65] : memref<2x2x8x128xf32, #tpu.memory_space<vmem>>, vector<1x2x8x128xf32>
      %145 = vector.shape_cast %144 : vector<1x2x8x128xf32> to vector<2x8x128xf32>
      %146 = vector.shape_cast %143 : vector<2x8x128xf32> to vector<1x2x8x128xf32>
      tpu.vector_store %arg5[%c1_62, %c0_63, %c0_64, %c0_65], %146 {strides = array<i32>} : memref<2x2x8x128xf32, #tpu.memory_space<vmem>>, vector<1x2x8x128xf32>,
    } else {
    }
    return
  }
  func.func @transform_0(%arg0: i32, %arg1: i32, %arg2: i32) -> (i32, i32, i32, i32) {
    %c0_i32 = arith.constant 0 : i32
    %c0_i32_0 = arith.constant 0 : i32
    %c0_i32_1 = arith.constant 0 : i32
    return %c0_i32, %arg2, %c0_i32_0, %arg0 : i32, i32, i32, i32
  }
  func.func @transform_1(%arg0: i32, %arg1: i32, %arg2: i32) -> (i32, i32, i32, i32) {
    %c0_i32 = arith.constant 0 : i32
    %c0_i32_0 = arith.constant 0 : i32
    return %c0_i32, %arg2, %arg1, %arg0 : i32, i32, i32, i32
  }
  func.func @transform_2(%arg0: i32, %arg1: i32, %arg2: i32) -> (i32, i32, i32, i32) {
    %c0_i32 = arith.constant 0 : i32
    %c0_i32_0 = arith.constant 0 : i32
    %c0_i32_1 = arith.constant 0 : i32
    return %c0_i32, %c0_i32_0, %arg1, %arg0 : i32, i32, i32, i32
  }
}

</mosaic_0001>

<bundles_post_ra>
// kernel: custom-call
= control target key start
LH: loop header
LB: loop body
LE: loop exit
PB: predicated region body
PF: predicated region fallthrough
CT: control target
= control target key end

     0   :  { %2 = vsyncpa [#allocation0], 0  ;;  %s55_s0 = inlined_call_operand.hbm [shape: c64[4,4,4,4], index: 0, kind: input, shape index: {}]   ;;  %s56_s1 = inlined_call_operand.vmem [shape: f32[4,4,4,4], index: 1, kind: output, shape index: {}]  }
   0x1   :  { %s4_s8 = sshll.u32 %s55_s0, 4  ;;  %s6_s11 = sshll.u32 %s56_s1, 4  ;;  %s5_s8 = int_to_ptr.hbm [resolvable:$true] %s4_s8  ;;  %s7_s11 = int_to_ptr.vmem [resolvable:$true] %s6_s11 }
   0x2   :  { %9 = dma.hbm_to_vmem [thread:$0]  %s5_s8, 1024, %s7_s11, [#allocation0] }
   0x3   :  { %37 = dma.done.wait [#allocation0], 1024  }
   0x4   :  { %38 = vsyncadd [#allocation0], 4294966272 }
   0x5   :  { %12 = vsyncpa [#allocation0], 1 }

// kernel: custom-call.1
= control target key start
LH: loop header
LB: loop body
LE: loop exit
PB: predicated region body
PF: predicated region fallthrough
CT: control target
= control target key end

     0   :  { %s56_s0 = inlined_call_operand.hbm [shape: c64[4,4,4,4], index: 0, kind: input, shape index: {}]   ;;  %s57_s1 = inlined_call_operand.vmem [shape: f32[4,4,4,4], index: 1, kind: output, shape index: {}]  }
   0x1   :  { %s2_s8 = scalar_lea.hbm %s56_s0, 64 }
   0x2   :  { %3 = vsyncpa [#allocation0], 0  ;;  %s5_s9 = sshll.u32 %s2_s8, 4  ;;  %s7_s12 = sshll.u32 %s57_s1, 4  ;;  %s6_s9 = int_to_ptr.hbm [resolvable:$true] %s5_s9  ;;  %s8_s12 = int_to_ptr.vmem [resolvable:$true] %s7_s12 }
   0x3   :  { %10 = dma.hbm_to_vmem [thread:$0]  %s6_s9, 1024, %s8_s12, [#allocation0] }
   0x4   :  { %38 = dma.done.wait [#allocation0], 1024  }
   0x5   :  { %39 = vsyncadd [#allocation0], 4294966272 }
   0x6   :  { %13 = vsyncpa [#allocation0], 1 }

// kernel: spectral_conv2d_forward.1
= control target key start
LH: loop header
LB: loop body
LE: loop exit
PB: predicated region body
PF: predicated region fallthrough
CT: control target
= control target key end

     0   :  { %s330_s0 = inlined_call_operand.vmem [shape: f32[2,4,2,128], index: 0, kind: input, shape index: {}]   ;;  %s331_s1 = inlined_call_operand.vmem [shape: f32[2,4,8,128], index: 1, kind: input, shape index: {}]   ;;  %s332_s2 = inlined_call_operand.vmem [shape: f32[2,2,8,128], index: 2, kind: output, shape index: {}]  }
   0x1   :  { %v11_v0 = vld [vmem:[%s330_s0] sm:$0x3]  ;;  %v183_v1 = vld [vmem:[%s330_s0 + $0x8] sm:$0x3]  ;;  %v185_v6 = vld [vmem:[%s330_s0 + $0x2] sm:$0x3] }
   0x2   :  { %v227_v2 = vld [vmem:[%s331_s1] sm:$0xff]  ;;  %v21_v4 = vperm.slane %v11_v0, 0  ;;  %v27_v5 = vperm.slane %v183_v1, 0  ;;  %v240_v7 = vld [vmem:[%s331_s1 + $0x8] sm:$0xff]  ;;  %v57_v10 = vperm.slane %v185_v6, 0  ;;  %v264_v16 = vld [vmem:[%s331_s1 + $0x10] sm:$0xff] }
   0x3   :  { %v232_v3 = vld [vmem:[%s331_s1 + $0x20] sm:$0xff]  ;;  %v245_v8 = vld [vmem:[%s330_s0 + $0xa] sm:$0x3]  ;;  %v190_v15 = vld [vmem:[%s330_s0 + $0xc] sm:$0x3]  ;;  %v13_v33 = vrot.slane %v11_v0, 1 }
   0x4   :  { %v250_v9 = vld [vmem:[%s331_s1 + $0x28] sm:$0xff]  ;;  %v189_v11 = vld [vmem:[%s330_s0 + $0x4] sm:$0x3]  ;;  %v25_v12 = vmul.f32 %v21_v4, %v227_v2  ;;  %v31_v13 = vmul.f32 %v232_v3, %v27_v5  ;;  %v63_v14 = vperm.slane %v245_v8, 0  ;;  %v269_v17 = vld [vmem:[%s331_s1 + $0x30] sm:$0xff]  ;;  %v61_v19 = vmul.f32 %v240_v7, %v57_v10 }
   0x5   :  { %v93_v18 = vperm.slane %v189_v11, 0  ;;  %v99_v20 = vperm.slane %v190_v15, 0  ;;  %v193_v21 = vld [vmem:[%s330_s0 + $0x6] sm:$0x3]  ;;  %v278_v22 = vld [vmem:[%s331_s1 + $0x18] sm:$0xff]  ;;  %v37_v23 = vmul.f32 %v232_v3, %v21_v4  ;;  %v39_v24 = vmul.f32 %v27_v5, %v227_v2 }
   0x6   :  { %v33_v25 = vsub.f32 %v25_v12, %v31_v13  ;;  %v67_v26 = vmul.f32 %v250_v9, %v63_v14  ;;  %v194_v28 = vld [vmem:[%s330_s0 + $0xe] sm:$0x3]  ;;  %v290_v29 = vld [vmem:[%s331_s1 + $0x38] sm:$0xff]  ;;  %v129_v30 = vperm.slane %v193_v21, 0  ;;  %v17_v34 = vrot.slane %v183_v1, 1 }
   0x7   :  { %v97_v27 = vmul.f32 %v264_v16, %v93_v18  ;;  %v103_v31 = vmul.f32 %v269_v17, %v99_v20  ;;  %v135_v32 = vperm.slane %v194_v28, 0  ;;  %v48_v37 = vrot.slane %v185_v6, 1 }
   0x8   :  { %v69_v35 = vsub.f32 %v61_v19, %v67_v26  ;;  %v133_v36 = vmul.f32 %v278_v22, %v129_v30  ;;  %v52_v38 = vrot.slane %v245_v8, 1  ;;  %v22_v41 = vperm.slane %v13_v33, 0 }
   0x9   :  { %v105_v39 = vsub.f32 %v97_v27, %v103_v31  ;;  %v139_v40 = vmul.f32 %v290_v29, %v135_v32  ;;  %v28_v42 = vperm.slane %v17_v34, 0  ;;  %v58_v44 = vperm.slane %v48_v37, 0 }
   0xa   :  { %v71_v43 = vadd.f32 %v69_v35, %v33_v25  ;;  %v64_v45 = vperm.slane %v52_v38, 0  ;;  %v84_v46 = vrot.slane %v189_v11, 1  ;;  %v26_v48 = vmul.f32 %v22_v41, %v227_v2 }
   0xb   :  { %v141_v47 = vsub.f32 %v133_v36, %v139_v40  ;;  %v32_v49 = vmul.f32 %v232_v3, %v28_v42  ;;  %v88_v50 = vrot.slane %v190_v15, 1  ;;  %v62_v52 = vmul.f32 %v240_v7, %v58_v44 }
   0xc   :  { %v107_v51 = vadd.f32 %v105_v39, %v71_v43  ;;  %v68_v53 = vmul.f32 %v250_v9, %v64_v45  ;;  %v94_v54 = vperm.slane %v84_v46, 0  ;;  %v120_v57 = vrot.slane %v193_v21, 1 }
   0xd   :  { %v34_v55 = vsub.f32 %v26_v48, %v32_v49  ;;  %v100_v56 = vperm.slane %v88_v50, 0  ;;  %v124_v58 = vrot.slane %v194_v28, 1  ;;  %v41_v62 = vadd.f32 %v39_v24, %v37_v23 }
   0xe   :  { %v143_v59 = vadd.f32 %v141_v47, %v107_v51  ;;  %v70_v60 = vsub.f32 %v62_v52, %v68_v53  ;;  %v98_v61 = vmul.f32 %v264_v16, %v94_v54  ;;  %v130_v0 = vperm.slane %v120_v57, 0 }
   0xf   :  { %v104_v63 = vmul.f32 %v269_v17, %v100_v56  ;;  %v136_v1 = vperm.slane %v124_v58, 0  ;;  %v73_v4 = vmul.f32 %v250_v9, %v57_v10  ;;  %v75_v6 = vmul.f32 %v240_v7, %v63_v14 }
  0x10   :  { %157 = vst [vmem:[%s332_s2] sm:$0xff] %v143_v59  ;;  %v72_v5 = vadd.f32 %v70_v60, %v34_v55  ;;  %v109_v8 = vmul.f32 %v269_v17, %v93_v18  ;;  %v111_v11 = vmul.f32 %v264_v16, %v99_v20  ;;  %v134_v13 = vmul.f32 %v278_v22, %v130_v0 }
  0x11   :  { %v106_v12 = vsub.f32 %v98_v61, %v104_v63  ;;  %v140_v15 = vmul.f32 %v290_v29, %v136_v1  ;;  %v145_v19 = vmul.f32 %v290_v29, %v129_v30  ;;  %v77_v21 = vadd.f32 %v75_v6, %v73_v4 }
  0x12   :  { %v113_v10 = vadd.f32 %v111_v11, %v109_v8  ;;  %v147_v23 = vmul.f32 %v278_v22, %v135_v32  ;;  %v38_v24 = vmul.f32 %v232_v3, %v22_v41  ;;  %v40_v14 = vmul.f32 %v28_v42, %v227_v2 }
  0x13   :  { %v108_v25 = vadd.f32 %v106_v12, %v72_v5  ;;  %v142_v26 = vsub.f32 %v134_v13, %v140_v15  ;;  %v74_v18 = vmul.f32 %v250_v9, %v58_v44  ;;  %v79_v20 = vadd.f32 %v77_v21, %v41_v62 }
  0x14   :  { %v149_v27 = vadd.f32 %v147_v23, %v145_v19  ;;  %v76_v28 = vmul.f32 %v240_v7, %v64_v45  ;;  %v110_v31 = vmul.f32 %v269_v17, %v94_v54  ;;  %v42_v30 = vadd.f32 %v40_v14, %v38_v24 }
  0x15   :  { %v144_v33 = vadd.f32 %v142_v26, %v108_v25  ;;  %v112_v34 = vmul.f32 %v264_v16, %v100_v56  ;;  %v146_v32 = vmul.f32 %v290_v29, %v130_v0  ;;  %v115_v35 = vadd.f32 %v113_v10, %v79_v20 }
  0x16   :  { %v78_v3 = vadd.f32 %v76_v28, %v74_v18  ;;  %v148_v36 = vmul.f32 %v278_v22, %v136_v1 }
  0x17   :  { %158 = vst [vmem:[%s332_s2 + $0x8] sm:$0xff] %v144_v33  ;;  %v114_v2 = vadd.f32 %v112_v34, %v110_v31  ;;  %v151_v9 = vadd.f32 %v149_v27, %v115_v35 }
  0x18   :  { %v80_v37 = vadd.f32 %v78_v3, %v42_v30  ;;  %v150_v7 = vadd.f32 %v148_v36, %v146_v32 }
  0x19   :  { %197 = vst [vmem:[%s332_s2 + $0x10] sm:$0xff] %v151_v9 }
  0x1a   :  { %v116_v17 = vadd.f32 %v114_v2, %v80_v37 }
  0x1c   :  { %v152_v16 = vadd.f32 %v150_v7, %v116_v17 }
  0x1e   :  { %198 = vst [vmem:[%s332_s2 + $0x18] sm:$0xff] %v152_v16 }

// kernel: reverse.0
= control target key start
LH: loop header
LB: loop body
LE: loop exit
PB: predicated region body
PF: predicated region fallthrough
CT: control target
= control target key end

     0   :  { %v72_v3 = vlaneseq  ;;  %v65_v6 = vld [vmem:[#allocation0 + $0x7] ss:$-1 sm:$0xff]  ;;  %v79_v8 = vld [vmem:[#allocation0 + $0x17] ss:$-1 sm:$0xff]  ;;  %s331_s0 = inlined_call_operand.vmem [shape: f32[2,4,16,7], index: 0, kind: input, shape index: {}]   ;;  %s332_s1 = inlined_call_operand.vmem [shape: f32[2,4,16,7], index: 1, kind: output, shape index: {}]  }
   0x1   :  { %v45_v0 = vld [vmem:[%s331_s0] sm:$0xff]  ;;  %v47_v1 = vld [vmem:[%s331_s0 + $0x8] sm:$0xff]  ;;  %v49_v2 = vld [vmem:[%s331_s0 + $0x10] sm:$0xff]  ;;  %v66_v12 = vrot.slane %v65_v6, 1  ;;  %v80_v13 = vrot.slane %v79_v8, 1 }
   0x2   :  { %46 = vst [vmem:[#allocation0 + $0x8] sm:$0xff] %v45_v0  ;;  %v51_v4 = vld [vmem:[%s331_s0 + $0x18] sm:$0xff]  ;;  %v53_v5 = vld [vmem:[%s331_s0 + $0x20] sm:$0xff]  ;;  %v55_v7 = vld [vmem:[%s331_s0 + $0x28] sm:$0xff]  ;;  %v73_v10 = vshrl.u32 %v72_v3, 7 }
   0x3   :  { %48 = vst [vmem:[#allocation0 + $0x18] sm:$0xff] %v47_v1  ;;  %v57_v9 = vld [vmem:[%s331_s0 + $0x30] sm:$0xff]  ;;  %v59_v11 = vld [vmem:[%s331_s0 + $0x38] sm:$0xff]  ;;  %v93_v14 = vld [vmem:[#allocation0 + $0x27] ss:$-1 sm:$0xff] }
   0x4   :  { %50 = vst [vmem:[#allocation0 + $0x28] sm:$0xff] %v49_v2  ;;  %vm74_vm0 = vcmp.lt.s32.totalorder %v73_v10, 7  ;;  %v107_v16 = vld [vmem:[#allocation0 + $0x37] ss:$-1 sm:$0xff]  ;;  %v94_v19 = vrot.slane %v93_v14, 1 }
   0x5   :  { %52 = vst [vmem:[#allocation0 + $0x38] sm:$0xff] %v51_v4  ;;  %v121_v22 = vld [vmem:[#allocation0 + $0x47] ss:$-1 sm:$0xff]  ;;  %v108_v24 = vrot.slane %v107_v16, 1  ;;  %v135_v28 = vld [vmem:[#allocation0 + $0x57] ss:$-1 sm:$0xff] }
   0x6   :  { %54 = vst [vmem:[#allocation0 + $0x48] sm:$0xff] %v53_v5  ;;  %v122_v29 = vrot.slane %v121_v22, 1  ;;  %v149_v32 = vld [vmem:[#allocation0 + $0x67] ss:$-1 sm:$0xff]  ;;  %v136_v33 = vrot.slane %v135_v28, 1 }
   0x7   :  { %56 = vst [vmem:[#allocation0 + $0x58] sm:$0xff] %v55_v7  ;;  %v163_v36 = vld [vmem:[#allocation0 + $0x77] ss:$-1 sm:$0xff]  ;;  %v150_v37 = vrot.slane %v149_v32, 1 }
   0x8   :  { %58 = vst [vmem:[#allocation0 + $0x68] sm:$0xff] %v57_v9  ;;  %v164_v40 = vrot.slane %v163_v36, 1 }
   0x9   :  { %60 = vst [vmem:[#allocation0 + $0x78] sm:$0xff] %v59_v11  ;;  %v70_v15 = vld [vmem:[#allocation0 + $0xf] ss:$-1 sm:$0xff] }
   0xa   :  { %67 = vst [vmem:[#allocation1] sm:$0xff] %v66_v12  ;;  %v71_v17 = vrot.slane %v70_v15, 1  ;;  %v84_v18 = vld [vmem:[#allocation0 + $0x1f] ss:$-1 sm:$0xff] }
   0xb   :  { %81 = vst [vmem:[#allocation1 + $0x8] sm:$0xff] %v80_v13  ;;  %v85_v20 = vrot.slane %v84_v18, 1  ;;  %v98_v21 = vld [vmem:[#allocation0 + $0x2f] ss:$-1 sm:$0xff] }
   0xc   :  { %75 = vst.msk [vmem:[#allocation1] sm:$0xff] %vm74_vm0, %v71_v17  ;;  %v99_v23 = vrot.slane %v98_v21, 1  ;;  %v112_v25 = vld [vmem:[#allocation0 + $0x3f] ss:$-1 sm:$0xff] }
   0xd   :  { %89 = vst.msk [vmem:[#allocation1 + $0x8] sm:$0xff] %vm74_vm0, %v85_v20  ;;  %v113_v26 = vrot.slane %v112_v25, 1  ;;  %v126_v27 = vld [vmem:[#allocation0 + $0x4f] ss:$-1 sm:$0xff] }
   0xe   :  { %95 = vst [vmem:[#allocation1 + $0x10] sm:$0xff] %v94_v19  ;;  %v140_v30 = vld [vmem:[#allocation0 + $0x5f] ss:$-1 sm:$0xff]  ;;  %v127_v31 = vrot.slane %v126_v27, 1 }
   0xf   :  { %103 = vst.msk [vmem:[#allocation1 + $0x10] sm:$0xff] %vm74_vm0, %v99_v23  ;;  %v154_v34 = vld [vmem:[#allocation0 + $0x6f] ss:$-1 sm:$0xff]  ;;  %v141_v35 = vrot.slane %v140_v30, 1 }
  0x10   :  { %109 = vst [vmem:[#allocation1 + $0x18] sm:$0xff] %v108_v24  ;;  %v168_v38 = vld [vmem:[#allocation0 + $0x7f] ss:$-1 sm:$0xff]  ;;  %v155_v39 = vrot.slane %v154_v34, 1 }
  0x11   :  { %117 = vst.msk [vmem:[#allocation1 + $0x18] sm:$0xff] %vm74_vm0, %v113_v26  ;;  %v169_v41 = vrot.slane %v168_v38, 1 }
  0x12   :  { %123 = vst [vmem:[#allocation1 + $0x20] sm:$0xff] %v122_v29 }
  0x13   :  { %131 = vst.msk [vmem:[#allocation1 + $0x20] sm:$0xff] %vm74_vm0, %v127_v31  ;;  %v216_v42 = vld [vmem:[#allocation1] sm:$0xff] }
  0x14   :  { %137 = vst [vmem:[#allocation1 + $0x28] sm:$0xff] %v136_v33  ;;  %v218_v43 = vld [vmem:[#allocation1 + $0x8] sm:$0xff] }
  0x15   :  { %145 = vst.msk [vmem:[#allocation1 + $0x28] sm:$0xff] %vm74_vm0, %v141_v35 }
  0x16   :  { %151 = vst [vmem:[#allocation1 + $0x30] sm:$0xff] %v150_v37  ;;  %v220_v44 = vld [vmem:[#allocation1 + $0x10] sm:$0xff] }
  0x17   :  { %159 = vst.msk [vmem:[#allocation1 + $0x30] sm:$0xff] %vm74_vm0, %v155_v39 }
  0x18   :  { %165 = vst [vmem:[#allocation1 + $0x38] sm:$0xff] %v164_v40  ;;  %v222_v45 = vld [vmem:[#allocation1 + $0x18] sm:$0xff] }
  0x19   :  { %173 = vst.msk [vmem:[#allocation1 + $0x38] sm:$0xff] %vm74_vm0, %v169_v41 }
  0x1a   :  { %217 = vst [vmem:[%s332_s1] sm:$0xff] %v216_v42  ;;  %v224_v46 = vld [vmem:[#allocation1 + $0x20] sm:$0xff] }
  0x1b   :  { %219 = vst [vmem:[%s332_s1 + $0x8] sm:$0xff] %v218_v43 }
  0x1c   :  { %221 = vst [vmem:[%s332_s1 + $0x10] sm:$0xff] %v220_v44  ;;  %v226_v47 = vld [vmem:[#allocation1 + $0x28] sm:$0xff] }
  0x1d   :  { %223 = vst [vmem:[%s332_s1 + $0x18] sm:$0xff] %v222_v45 }
  0x1e   :  { %225 = vst [vmem:[%s332_s1 + $0x20] sm:$0xff] %v224_v46  ;;  %v228_v48 = vld [vmem:[#allocation1 + $0x30] sm:$0xff] }
  0x1f   :  { %227 = vst [vmem:[%s332_s1 + $0x28] sm:$0xff] %v226_v47 }
  0x20   :  { %229 = vst [vmem:[%s332_s1 + $0x30] sm:$0xff] %v228_v48  ;;  %v230_v49 = vld [vmem:[#allocation1 + $0x38] sm:$0xff] }
  0x21   :  { %231 = vst [vmem:[%s332_s1 + $0x38] sm:$0xff] %v230_v49 }

</bundles_post_ra>
